<compile_context>
chip_gen: v6e
topology: v6e:2x2x1
jax: 0.10.0
libtpu: 0.0.40
codegen_flags: <defaults>
</compile_context>

<pallas_src>
import functools

import jax
import jax.numpy as jnp
import numpy as np
from jax.experimental import pallas as pl
from jax.experimental.pallas import tpu as pltpu


def _focal_loss_kernel(logits_ref, target_ref, out_ref, *,
                       gamma, ignore_index, n_rows, tile_n):
    i = pl.program_id(0)

    x = logits_ref[...].astype(jnp.float32)               # [T, C] f32
    t = target_ref[...]                                    # [T, 1] int32
    T, C = x.shape

    # Row-wise stable logsumexp.  Max stays on the XLU; the two lane-axis sum
    # reductions go through the MXU (matmul vs. a constant ones[C, 128]).
    m = jnp.max(x, axis=1, keepdims=True)                  # [T, 1]  (XLU)
    z = x - m                                              # [T, C]
    exp_z = jnp.exp(z)                                     # [T, C]  (EUP)

    ones = jnp.ones((C, 128), jnp.float32)                 # MXU RHS constant
    sum_exp = jnp.dot(exp_z, ones,
                      preferred_element_type=jnp.float32)[:, :1]     # [T, 1]
    lse = jnp.log(sum_exp)                                 # [T, 1]

    # Gather the target column of z: one-hot select, then MXU row-sum.
    col = jax.lax.broadcasted_iota(jnp.int32, (1, C), 1)   # [1, C] -> broadcast
    masked_z = jnp.where(col == t, z, 0.0)                 # [T, C]
    z_t = jnp.dot(masked_z, ones,
                  preferred_element_type=jnp.float32)[:, :1]          # [T, 1]

    # Focal modulation on the [T, 1] column only.
    logpt_t = z_t - lse                                    # [T, 1]
    pt_t = jnp.exp(logpt_t)
    one_minus = 1.0 - pt_t
    if float(gamma).is_integer() and gamma >= 0:
        g = int(gamma)
        if g == 0:
            mod = jnp.ones_like(logpt_t)
        else:
            mod = one_minus
            for _ in range(g - 1):
                mod = mod * one_minus                      # gamma=2 -> d*d (VPU)
    else:
        mod = jnp.power(jnp.maximum(one_minus, 0.0), gamma)
    focal_t = mod * logpt_t                                # [T, 1]

    # Validity: not ignore_index AND within the real N (ragged last tile).
    # NOTE: padded rows of the last block may hold NaN/Inf garbage, so this
    # MUST remain a select (jnp.where) - never `keep * focal_t`.
    row = jax.lax.broadcasted_iota(jnp.int32, t.shape, 0) + i * tile_n
    keep = (t != ignore_index) & (row < n_rows)            # [T, 1]

    tile_total = jnp.sum(jnp.where(keep, focal_t, 0.0))
    tile_count = jnp.sum(jnp.where(keep, 1.0, 0.0))

    # Single packed, lane-dense output slab: total in sublane 0, count in
    # sublane 1 (one output DMA per grid step instead of two).
    sub = jax.lax.broadcasted_iota(jnp.int32, out_ref.shape, 1)
    out_ref[...] = jnp.where(sub == 0, tile_total,
                             jnp.where(sub == 1, tile_count, 0.0))


def _vmem_limit_bytes():
    """Generation-aware scoped-VMEM limit (~3/4 of physical, <= 100 MiB)."""
    try:
        cap = int(pltpu.get_tpu_info().vmem_capacity_bytes)
    except Exception:
        cap = 64 * 1024 * 1024          # conservative fallback (v7x per-TC)
    return min((cap * 3) // 4, 100 * 1024 * 1024)


def _choose_tile_n(n, c, in_itemsize, vmem_limit, min_grid_steps=4):
    """Largest row tile whose working set fits the VMEM budget.

    Working-set model: double-buffered input block (2 * T*C*itemsize) plus
    ~4 f32 [T, C] temporaries inside the kernel (x_f32, z, exp_z, masked_z).
    Also keeps >= min_grid_steps grid steps so both v7x TensorCores get work.
    """
    if n <= 8:
        return n                         # full-extent block (always legal)
    bytes_per_row = 2 * c * in_itemsize + 4 * c * 4
    budget = int(vmem_limit * 0.75)      # headroom for output/constants/scratch
    vmem_rows = max(8, (budget // max(1, bytes_per_row)) // 8 * 8)
    split_rows = max(8, ((-(-n // min_grid_steps)) + 7) // 8 * 8)
    tile = min(vmem_rows, split_rows)
    return n if tile >= n else tile


def focal_loss(logits, target, *, gamma=2.0, ignore_index=-100):
    """logits: [N, C] float (f32 or bf16), target: [N] int. Scalar f32 loss."""
    N, C = logits.shape
    t2 = target.reshape(N, 1).astype(jnp.int32)

    vmem_limit = _vmem_limit_bytes()
    itemsize = jnp.dtype(logits.dtype).itemsize
    tile_n = _choose_tile_n(N, C, itemsize, vmem_limit)
    num_tiles = pl.cdiv(N, tile_n)

    kernel = functools.partial(
        _focal_loss_kernel,
        gamma=float(gamma),
        ignore_index=int(ignore_index),
        n_rows=int(N),
        tile_n=int(tile_n),
    )

    partials = pl.pallas_call(
        kernel,
        out_shape=jax.ShapeDtypeStruct((num_tiles, 8, 128), jnp.float32),
        grid=(num_tiles,),
        in_specs=[
            pl.BlockSpec((tile_n, C), lambda i: (i, 0)),
            pl.BlockSpec((tile_n, 1), lambda i: (i, 0)),
        ],
        out_specs=pl.BlockSpec((1, 8, 128), lambda i: (i, 0, 0)),
        compiler_params=pltpu.CompilerParams(
            dimension_semantics=("parallel",),   # v7x: split tiles across TCs
            vmem_limit_bytes=int(vmem_limit),
        ),
    )(logits, t2)

    total = jnp.sum(partials[:, 0, 0])
    count = jnp.sum(partials[:, 1, 0])
    # nll_loss(reduction='mean', weight=None): mean over non-ignored rows.
    # (count == 0 -> NaN, matching PyTorch.)
    # TODO(synk): if valid-row counts can exceed 2^24, sum counts as int32.
    return -total / count


def _ref_focal_loss(logits, target, *, gamma=2.0, ignore_index=-100):
    """Pure-JAX reference matching the PyTorch module."""
    logpt = jax.nn.log_softmax(logits.astype(jnp.float32), axis=1)
    pt = jnp.exp(logpt)
    focal = (1.0 - pt) ** gamma * logpt
    valid = target != ignore_index
    safe_t = jnp.where(valid, target, 0)
    picked = jnp.take_along_axis(focal, safe_t[:, None], axis=1)[:, 0]
    return -jnp.sum(jnp.where(valid, picked, 0.0)) / jnp.sum(valid)


if __name__ == "__main__":
    # Small shapes consistent with forward(): input [N, C], target [N].
    # N=40 exercises multiple grid tiles AND a ragged (padded) last tile.
    N, C = 40, 32
    key = jax.random.PRNGKey(0)
    k_logits, k_target = jax.random.split(key)

    logits = jax.random.normal(k_logits, (N, C), dtype=jnp.float32)
    target = jax.random.randint(k_target, (N,), 0, C, dtype=jnp.int32)
    target = target.at[3].set(-100)   # exercise ignore_index
    target = target.at[37].set(-100)  # ignore_index in the ragged last tile

    loss = focal_loss(logits, target, gamma=2.0, ignore_index=-100)
    loss = jax.block_until_ready(loss)

    ref = _ref_focal_loss(logits, target, gamma=2.0, ignore_index=-100)
    np.testing.assert_allclose(np.asarray(loss), np.asarray(ref), rtol=1e-5, atol=1e-5)

    print("KERNEL_OK")
</pallas_src>

<mosaic_0001>
module attributes {stable_mosaic.version = 11 : i64} {
  func.func @_focal_loss_kernel(%arg0: i32, %arg1: memref<16x32xf32, #tpu.memory_space<vmem>>, %arg2: memref<16x1xi32, #tpu.memory_space<vmem>>, %arg3: memref<1x8x128xf32, #tpu.memory_space<vmem>>) attributes {dimension_semantics = [#tpu.dimension_semantics<parallel>], iteration_bounds = array<i64: 3>, scalar_prefetch = 0 : i64, scratch_operands = 0 : i64, tpu.core_type = #tpu.core_type<tc>, window_params = [{transform_indices = @transform_0, window_bounds = array<i64: 16, 32>}, {transform_indices = @transform_1, window_bounds = array<i64: 16, 1>}, {transform_indices = @transform_2, window_bounds = array<i64: 1, 8, 128>}]} {
    %c0 = arith.constant 0 : index
    %c0_0 = arith.constant 0 : index
    %0 = vector.load %arg1[%c0, %c0_0] : memref<16x32xf32, #tpu.memory_space<vmem>>, vector<16x32xf32>
    %c0_1 = arith.constant 0 : index
    %c0_2 = arith.constant 0 : index
    %1 = vector.load %arg2[%c0_1, %c0_2] : memref<16x1xi32, #tpu.memory_space<vmem>>, vector<16x1xi32>
    %cst = arith.constant dense<0xFF800000> : vector<16xf32>
    %2 = vector.multi_reduction <maximumf>, %0, %cst [1] : vector<16x32xf32> to vector<16xf32>
    %3 = vector.shape_cast %2 : vector<16xf32> to vector<16x1xf32>
    %4 = vector.broadcast %3 : vector<16x1xf32> to vector<16x32xf32>
    %5 = arith.subf %0, %4 : vector<16x32xf32>
    %6 = math.exp %5 : vector<16x32xf32>
    %cst_3 = arith.constant 1.000000e+00 : f32
    %7 = vector.broadcast %cst_3 : f32 to vector<32x128xf32>
    %cst_4 = arith.constant dense<0.000000e+00> : vector<16x128xf32>
    %8 = tpu.matmul %6, %7, %cst_4 {dimension_numbers = #tpu.dot_dimension_numbers<[1], [0], [0], [1], [0, 0, 1, 1], [], []>} : vector<16x32xf32>, vector<32x128xf32>, vector<16x128xf32> -> vector<16x128xf32>
    %9 = vector.extract_strided_slice %8 {offsets = [0, 0], sizes = [16, 1], strides = [1, 1]} : vector<16x128xf32> to vector<16x1xf32>
    %10 = math.log %9 : vector<16x1xf32>
    %11 = tpu.iota {dimensions = array<i32: 1>} : vector<1x32xi32>
    %12 = vector.broadcast %11 : vector<1x32xi32> to vector<16x32xi32>
    %13 = vector.broadcast %1 : vector<16x1xi32> to vector<16x32xi32>
    %14 = arith.cmpi eq, %12, %13 : vector<16x32xi32>
    %cst_5 = arith.constant 0.000000e+00 : f32
    %15 = vector.broadcast %cst_5 : f32 to vector<16x32xf32>
    %16 = arith.select %14, %5, %15 : vector<16x32xi1>, vector<16x32xf32>
    %cst_6 = arith.constant dense<0.000000e+00> : vector<16x128xf32>
    %17 = tpu.matmul %16, %7, %cst_6 {dimension_numbers = #tpu.dot_dimension_numbers<[1], [0], [0], [1], [0, 0, 1, 1], [], []>} : vector<16x32xf32>, vector<32x128xf32>, vector<16x128xf32> -> vector<16x128xf32>
    %18 = vector.extract_strided_slice %17 {offsets = [0, 0], sizes = [16, 1], strides = [1, 1]} : vector<16x128xf32> to vector<16x1xf32>
    %19 = arith.subf %18, %10 : vector<16x1xf32>
    %20 = math.exp %19 : vector<16x1xf32>
    %cst_7 = arith.constant 1.000000e+00 : f32
    %21 = vector.broadcast %cst_7 : f32 to vector<16x1xf32>
    %22 = arith.subf %21, %20 : vector<16x1xf32>
    %23 = arith.mulf %22, %22 : vector<16x1xf32>
    %24 = arith.mulf %23, %19 : vector<16x1xf32>
    %25 = tpu.iota {dimensions = array<i32: 0>} : vector<16x1xi32>
    %c16_i32 = arith.constant 16 : i32
    %26 = arith.muli %arg0, %c16_i32 : i32
    %27 = vector.broadcast %26 : i32 to vector<16x1xi32>
    %28 = arith.addi %25, %27 : vector<16x1xi32>
    %c-100_i32 = arith.constant -100 : i32
    %29 = vector.broadcast %c-100_i32 : i32 to vector<16x1xi32>
    %30 = arith.cmpi ne, %1, %29 : vector<16x1xi32>
    %c40_i32 = arith.constant 40 : i32
    %31 = vector.broadcast %c40_i32 : i32 to vector<16x1xi32>
    %32 = arith.cmpi slt, %28, %31 : vector<16x1xi32>
    %33 = arith.andi %30, %32 : vector<16x1xi1>
    %cst_8 = arith.constant 0.000000e+00 : f32
    %34 = vector.broadcast %cst_8 : f32 to vector<16x1xf32>
    %35 = arith.select %33, %24, %34 : vector<16x1xi1>, vector<16x1xf32>
    %36 = vector.shape_cast %35 : vector<16x1xf32> to vector<1x16x1xf32>
    %cst_9 = arith.constant dense<0.000000e+00> : vector<1xf32>
    %37 = vector.multi_reduction <add>, %36, %cst_9 [1, 2] : vector<1x16x1xf32> to vector<1xf32>
    %38 = vector.shape_cast %37 : vector<1xf32> to vector<1x1x1xf32>
    %39 = vector.extract %38[0, 0, 0] : f32 from vector<1x1x1xf32>
    %cst_10 = arith.constant 1.000000e+00 : f32
    %cst_11 = arith.constant 0.000000e+00 : f32
    %40 = vector.broadcast %cst_10 : f32 to vector<16x1xf32>
    %41 = vector.broadcast %cst_11 : f32 to vector<16x1xf32>
    %42 = arith.select %33, %40, %41 : vector<16x1xi1>, vector<16x1xf32>
    %43 = vector.shape_cast %42 : vector<16x1xf32> to vector<1x16x1xf32>
    %cst_12 = arith.constant dense<0.000000e+00> : vector<1xf32>
    %44 = vector.multi_reduction <add>, %43, %cst_12 [1, 2] : vector<1x16x1xf32> to vector<1xf32>
    %45 = vector.shape_cast %44 : vector<1xf32> to vector<1x1x1xf32>
    %46 = vector.extract %45[0, 0, 0] : f32 from vector<1x1x1xf32>
    %47 = tpu.iota {dimensions = array<i32: 1>} : vector<1x8x128xi32>
    %c0_i32 = arith.constant 0 : i32
    %48 = vector.broadcast %c0_i32 : i32 to vector<1x8x128xi32>
    %49 = arith.cmpi eq, %47, %48 : vector<1x8x128xi32>
    %c1_i32 = arith.constant 1 : i32
    %50 = vector.broadcast %c1_i32 : i32 to vector<1x8x128xi32>
    %51 = arith.cmpi eq, %47, %50 : vector<1x8x128xi32>
    %cst_13 = arith.constant 0.000000e+00 : f32
    %52 = vector.broadcast %46 : f32 to vector<1x8x128xf32>
    %53 = vector.broadcast %cst_13 : f32 to vector<1x8x128xf32>
    %54 = arith.select %51, %52, %53 : vector<1x8x128xi1>, vector<1x8x128xf32>
    %55 = vector.broadcast %39 : f32 to vector<1x8x128xf32>
    %56 = arith.select %49, %55, %54 : vector<1x8x128xi1>, vector<1x8x128xf32>
    %c0_14 = arith.constant 0 : index
    %c0_15 = arith.constant 0 : index
    %c0_16 = arith.constant 0 : index
    %57 = vector.load %arg3[%c0_14, %c0_15, %c0_16] : memref<1x8x128xf32, #tpu.memory_space<vmem>>, vector<1x8x128xf32>
    tpu.vector_store %arg3[%c0_14, %c0_15, %c0_16], %56 {strides = array<i32>} : memref<1x8x128xf32, #tpu.memory_space<vmem>>, vector<1x8x128xf32>,
    return
  }
  func.func @transform_0(%arg0: i32) -> (i32, i32) {
    %c0_i32 = arith.constant 0 : i32
    %c0_i32_0 = arith.constant 0 : i32
    return %arg0, %c0_i32 : i32, i32
  }
  func.func @transform_1(%arg0: i32) -> (i32, i32) {
    %c0_i32 = arith.constant 0 : i32
    %c0_i32_0 = arith.constant 0 : i32
    return %arg0, %c0_i32 : i32, i32
  }
  func.func @transform_2(%arg0: i32) -> (i32, i32, i32) {
    %c0_i32 = arith.constant 0 : i32
    %c0_i32_0 = arith.constant 0 : i32
    %c0_i32_1 = arith.constant 0 : i32
    return %arg0, %c0_i32, %c0_i32_0 : i32, i32, i32
  }
}

</mosaic_0001>

<bundles_post_ra>
// kernel: tpu_custom_call.1
= control target key start
LH: loop header
LB: loop body
LE: loop exit
PB: predicated region body
PF: predicated region fallthrough
CT: control target
= control target key end

     0   :  { %7 = vsyncpa [#allocation3], 0  ;;  %s868_s0 = inlined_call_operand.vmem [shape: f32[40,32], index: 0, kind: input, shape index: {}]   ;;  %s869_s1 = inlined_call_operand.vmem [shape: s32[40,1], index: 1, kind: input, shape index: {}]   ;;  %s870_s2 = inlined_call_operand.hbm [shape: f32[3,8,128], index: 2, kind: output, shape index: {}]  }
   0x1   :  { %9 = vsyncpa [#allocation3 + $0x1], 0  ;;  %s740_s9 = smov 0   ;;  %s742_s10 = smov 0  }
   0x2   :  { %s744_s11 = smov 0   ;;  %s746_s12 = smov 0  }
   0x3 LB: > { %s761_s13 = sadd.s32 4294967295, %s719_s12   ;;  %s547_s14 = sadd.s32 4294967294, %s719_s12   ;;  %s719_s12 = sphi %s746_s12, %s880_s12   ;;  %s715_s11 = sphi %s744_s11, %s879_s11   ;;  %s711_s10 = sphi %s742_s10, %s878_s10   ;;  %s707_s9 = sphi %s740_s9, %s877_s9  }
   0x4   : > { %s765_s15 = sadd.s32 1, %s719_s12   ;;  %s74_s16 = sadd.s32 1, %s715_s11 }
   0x5   : > { %s71_s17 = ssub.s32 %s719_s12, %s765_s15  ;;  %p84_p0 = scmp.ne.s32.totalorder %s715_s11, %s711_s10 }
   0x6   : > { %p72_p1 = scmp.eq.s32.totalorder %s71_s17, 0  ;;  %p85_p2 = scmp.eq.s32.totalorder %s761_s13, 2 }
   0x7   : > { %p90_p3 = scmp.ne.s32.totalorder %s711_s10, %s707_s9  ;;  %p91_p4 = scmp.eq.s32.totalorder %s547_s14, 2 }
   0x8   : > { %s776_s18 = scalar_select %p72_p1, %s715_s11, %s74_s16  }
   0x9   : > { %p778_p5 = por %p85_p2, %p84_p0  ;;  %p782_p6 = por %p91_p4, %p90_p3 }
   0xa   : > { %p550_p7 = scmp.ge.s32.totalorder %s719_s12, 1  ;;  %p143_p8 = scmp.lt.s32.totalorder %s719_s12, 4 }
   0xc   : > { %p144_p9 = pnand %p550_p7, %p143_p8 }
   0xd   : > { %s552_s21 = sshll.u32 (!%p144_p9), %s761_s13, 1  ;;  %s560_s29 = sshll.u32 (!%p144_p9), %s761_s13, 4 }
   0xe   : > { %147 = sbr.rel (%p144_p9) target bundleno = 644 (0x284), region = 28  ;;  %p183_p10 = scmp.lt.s32.totalorder (!%p144_p9), %s552_s21, 4 }
   0xf   : > { %s175_s30 = sand.u32 (!%p144_p9), 1, %s711_s10   ;;  %s562_s4 = sshll.u32 (!%p144_p9), %s761_s13, 7 }
  0x10   : > { %s551_s3 = sshll.u32 (!%p144_p9), %s175_s30, 3  ;;  %s833_s17 = scalar_lea.hbm (!%p144_p9), %s870_s2, %s562_s4 }
  0x11   : > { %s177_s6 = scalar_lea.vmem (!%p144_p9), [#allocation2], %s551_s3  ;;  %s463_s13 = scalar_lea.sflag (!%p144_p9), [#allocation3], %s175_s30 }
  0x12   : > { %s476_s7 = sshll.u32 (!%p144_p9), %s177_s6, 4  ;;  %s477_s7 = int_to_ptr.vmem [resolvable:$true] %s476_s7 }
  0x13   : > { %v721_v0 = vmov 0   ;;  %v722_v1 = vmov 1.0   ;;  %s882_s21 = smov (!%p183_p10, %s552_s21), 4  ;;  %vm210_vm0 = vcmask 261120   ;;  %v308_v8 = vlaneseq }
  0x14   : > { %645 = vset.pattern.permute.xlu1 %v721_v0  ;;  %588 = vmatprep.subr.mxu1 %v722_v1  ;;  %s553_s22 = sshll.u32 %s882_s21, 3  ;;  %v417_v23 = vstv %s560_s29  ;;  %vm428_vm9 = vcmask 7168   ;;  %v723_v29 = vmov 0.0   ;;  %s659_s21 = scalar_lea.vmem %s477_s7, 128 }
  0x15   : > { %589 = vmatpush3.msra.mxu1 %v722_v1  ;;  %577 = vmatprep.subr.mxu0 %v722_v1  ;;  %s186_s25 = scalar_lea.vmem %s868_s0, %s553_s22  ;;  %s200_s28 = scalar_lea.vmem %s869_s1, %s553_s22  ;;  %v309_v10 = vand.u32 127, %v308_v8  ;;  %v801_v22 = vshrl.u32 %v308_v8, 7 }
  0x16   : > { %590 = vmatprep.subr.mxu1 %v722_v1  ;;  %578 = vmatpush3.msra.mxu0 %v722_v1  ;;  %v206_v2 = vld [vmem:[%s186_s25] sm:$0xff]  ;;  %v207_v3 = vld [vmem:[%s186_s25 + $0x8] sm:$0xff]  ;;  %p660_p11 = scmp.ne.s32.totalorder %s477_s7, %s659_s21  ;;  %s724_s22 = smov [#allocation2]  }
  0x17   : > { %591 = vmatpush3.msra.mxu1 %v722_v1  ;;  %579 = vmatprep.subr.mxu0 %v722_v1  ;;  %v208_v4 = vld [vmem:[%s200_s28] sm:$0xff]  ;;  %v211_v5 = vsel %vm210_vm0, %v206_v2, -inf  ;;  %v209_v6 = vld [vmem:[%s200_s28 + $0x8] sm:$0xff]  ;;  %v214_v7 = vsel %vm210_vm0, %v207_v3, -inf  ;;  %v415_v24 = vadd.s32 8, %v801_v22  ;;  %v418_v25 = vadd.s32 %v417_v23, %v801_v22  ;;  %s663_s23 = sshll.u32 %s724_s22, 4  ;;  %s664_s23 = int_to_ptr.vmem [resolvable:$false] %s663_s23 }
  0x18   : > { %592 = vmatprep.subr.mxu1 %v722_v1  ;;  %580 = vmatpush3.msra.mxu0 %v722_v1  ;;  %vm420_vm4 = vcmp.ne.s32.totalorder %v208_v4, 4294967196  ;;  %vm421_vm5 = vcmp.ne.s32.totalorder %v209_v6, 4294967196  ;;  %vm456_vm10 = vcmp.eq.s32.totalorder %v801_v22, 1  ;;  %vm455_vm11 = vcmp.eq.s32.totalorder %v801_v22, 0  ;;  %p661_p12 = pnand %p660_p11, %p778_p5  ;;  %s665_s24 = scalar_lea.vmem %s664_s23, 256 }
  0x19   : > { %593 = vmatpush3.msra.mxu1 %v722_v1  ;;  %581 = vmatprep.subr.mxu0 %v722_v1  ;;  %v419_v26 = vadd.s32 %v417_v23, %v415_v24  ;;  %vm422_vm3 = vcmp.lt.s32.totalorder %v418_v25, 40  ;;  %p666_p0 = scmp.lt.s32.totalorder %s477_s7, %s664_s23  ;;  %p667_p1 = scmp.lt.s32.totalorder %s665_s24, %s659_s21 }
  0x1a   : > { %594 = vmatprep.subr.mxu1 %v722_v1  ;;  %582 = vmatpush3.msra.mxu0 %v722_v1  ;;  %vm806_vm7 = vmand %vm420_vm4, %vm422_vm3  ;;  %p662_p13 = pneg %p661_p12 }
  0x1b   : > { %311 = vperm.xlu1 %645, %v208_v4   ;;  %595 = vmatpush3.msra.mxu1 %v722_v1  ;;  %vm423_vm6 = vcmp.lt.s32.totalorder %v419_v26, 40  ;;  %v441_v30 = vsel %vm806_vm7, 1.0, %v723_v29  ;;  %p668_p2 = por %p667_p1, %p666_p0 }
  0x1c   : > { %212 = vmax.xlane.f32.xlu0 %v211_v5  ;;  %583 = vmatprep.subr.mxu0 %v722_v1  ;;  %vm810_vm8 = vmand %vm421_vm5, %vm423_vm6  ;;  %v443_v32 = vsel %vm428_vm9, %v441_v30, 0.0 }
  0x1d   : > { %584 = vmatpush3.msra.mxu0 %v722_v1  ;;  %646 = vset.pattern.permute.xlu0 %v721_v0  ;;  %v442_v31 = vsel %vm810_vm8, 1.0, %v723_v29  ;;  %p669_p3 = pnand %p668_p2, %p662_p13 }
  0x1e   : > { %v444_v33 = vsel %vm428_vm9, %v442_v31, 0.0 }
  0x1f   : > { %314 = vperm.xlu1 %645, %v209_v6   ;;  %v445_v34 = vadd.f32 %v444_v33, %v443_v32 }
  0x20   : > { %215 = vmax.xlane.f32.xlu0 %v214_v7 }
  0x43   : > { %446 = vadd.xlane.f32.xlu1 %v445_v34 }
  0x96   : > { %v312_v9 = vpop.permute.xlu1 %311 }
  0x97   : > { %vm316_vm1 = vcmp.eq.s32.totalorder %v309_v10, %v312_v9 }
  0x9a   : > { %v315_v13 = vpop.permute.xlu1 %314 }
  0x9b   : > { %vm317_vm2 = vcmp.eq.s32.totalorder %v309_v10, %v315_v13 }
  0xa5   : > { %v213_v11 = vpop.xlane.xlu0 %212 }
  0xa6   : > { %v217_v12 = vsub.f32 %v206_v2, %v213_v11 }
  0xa8   : > { %v219_v14 = vmul.f32 1.442695, %v217_v12  ;;  %v318_v15 = vsel %vm316_vm1, %v217_v12, 0.0 }
  0xa9   : > { %596 = vmatprep.mubr.msk.f32.mxu1 %vm210_vm0, %v318_v15  ;;  %v216_v16 = vpop.xlane.xlu0 %215 }
  0xaa   : > { %647 = vpow2.f32 %v219_v14  ;;  %v218_v17 = vsub.f32 %v207_v3, %v216_v16 }
  0xac   : > { %v221_v18 = vmul.f32 1.442695, %v218_v17  ;;  %v319_v19 = vsel %vm317_vm2, %v218_v17, 0.0 }
  0xad   : > { %597 = vmatmul.mubr.msk.f32.vlgmr.msra.gmra.mxu1 %vm210_vm0, %v319_v19 }
  0xae   : > { %649 = vpow2.f32 %v221_v18 }
  0xb7   : > { %v648_v20 = vpop.eup %647 }
  0xb8   : > { %585 = vmatprep.mubr.msk.f32.mxu0 %vm210_vm0, %v648_v20 }
  0xbb   : > { %v650_v21 = vpop.eup %649 }
  0xbc   : > { %586 = vmatmul.mubr.msk.f32.vlgmr.msra.gmra.mxu0 %vm210_vm0, %v650_v21 }
  0xcc   : > { %v447_v60 = vpop.xlane.xlu1 %446 }
  0xcd   : > { %v448_v61 = vrot.slane %v447_v60, 4 }
  0xcf   : > { %v449_v62 = vadd.f32 %v448_v61, %v447_v60 }
  0xd1   : > { %v450_v63 = vrot.slane %v449_v62, 2 }
  0xd3   : > { %v451_v3 = vadd.f32 %v450_v63, %v449_v62 }
  0xd5   : > { %v452_v6 = vrot.slane %v451_v3, 1 }
  0xd7   : > { %v453_v9 = vadd.f32 %v452_v6, %v451_v3 }
 0x16d   : > { %v598_v38 = vpop.f32.mrf.mxu1 }
 0x16f   : > { %v392_v43 = vpop.f32.mrf.mxu1 }
 0x17c   : > { %v587_v35 = vpop.f32.mrf.mxu0 }
 0x17d   : > { %651 = vlog2.f32 %v587_v35 }
 0x17e   : > { %v295_v36 = vpop.f32.mrf.mxu0 }
 0x17f   : > { %653 = vlog2.f32 %v295_v36 }
 0x18a   : > { %v652_v37 = vpop.eup %651 }
 0x18b   : > { %v307_v39 = vmul.f32 0.6931472, %v652_v37 }
 0x18c   : > { %v654_v40 = vpop.eup %653 }
 0x18d   : > { %v402_v41 = vsub.f32 %v598_v38, %v307_v39  ;;  %v305_v42 = vmul.f32 0.6931472, %v654_v40 }
 0x18f   : > { %v405_v44 = vmul.f32 1.442695, %v402_v41  ;;  %v401_v45 = vsub.f32 %v392_v43, %v305_v42 }
 0x191   : > { %655 = vpow2.f32 %v405_v44  ;;  %v403_v46 = vmul.f32 1.442695, %v401_v45 }
 0x193   : > { %657 = vpow2.f32 %v403_v46 }
 0x19e   : > { %v656_v47 = vpop.eup %655 }
 0x19f   : > { %v408_v48 = vsub.f32 1.0, %v656_v47 }
 0x1a0   : > { %v658_v49 = vpop.eup %657 }
 0x1a1   : > { %v407_v50 = vsub.f32 1.0, %v658_v49  ;;  %v410_v51 = vmul.f32 %v408_v48, %v408_v48 }
 0x1a3   : > { %v409_v52 = vmul.f32 %v407_v50, %v407_v50  ;;  %v412_v53 = vmul.f32 %v410_v51, %v402_v41 }
 0x1a5   : > { %v411_v54 = vmul.f32 %v409_v52, %v401_v45  ;;  %v427_v55 = vsel %vm810_vm8, %v412_v53, 0.0 }
 0x1a6   : > { %v430_v58 = vsel %vm428_vm9, %v427_v55, 0.0 }
 0x1a7   : > { %v426_v56 = vsel %vm806_vm7, %v411_v54, 0.0 }
 0x1a8   : > { %v429_v57 = vsel %vm428_vm9, %v426_v56, 0.0 }
 0x1a9   : > { %v431_v59 = vadd.f32 %v430_v58, %v429_v57 }
 0x1ab   : > { %432 = vadd.xlane.f32.xlu0 %v431_v59 }
 0x234   : > { %v433_v0 = vpop.xlane.xlu0 %432 }
 0x235   : > { %v434_v1 = vrot.slane %v433_v0, 4 }
 0x237   : > { %v435_v2 = vadd.f32 %v434_v1, %v433_v0 }
 0x239   : > { %v436_v4 = vrot.slane %v435_v2, 2 }
 0x23b   : > { %v437_v5 = vadd.f32 %v436_v4, %v435_v2 }
 0x23d   : > { %v438_v7 = vrot.slane %v437_v5, 1 }
 0x23f   : > { %v439_v8 = vadd.f32 %v438_v7, %v437_v5 }
 0x241   : > { %599 = vpush %v439_v8 }
 0x242   : > { %601 = vpush %v453_v9 }
 0x272   : > { %s600_s5 = spop %599 }
 0x273   : > { %v459_v10 = vstv %s600_s5  ;;  %s602_s8 = spop %601 }
 0x274   : > { %v457_v11 = vstv %s602_s8 }
 0x275   : > { %v458_v12 = vsel %vm456_vm10, %v457_v11, 0.0 }
 0x276   : > { %v460_v13 = vsel %vm455_vm11, %v459_v10, %v458_v12 }
 0x277   : > { %461 = vst [vmem:[%s177_s6] sm:$0xff] %v460_v13 }
 0x278   : > { %672 = shalt.err (!%p669_p3)
}
 0x279   : > { %s673_s25 = scalar_lea.hbm %s833_s17, 128  ;;  %s677_s28 = scalar_lea.hbm %s870_s2, 384 }
 0x27a   : > { %p674_p4 = scmp.ne.s32.totalorder %s833_s17, %s673_s25  ;;  %p678_p9 = scmp.lt.s32.totalorder %s833_s17, %s870_s2 }
 0x27b   : > { %p679_p10 = scmp.lt.s32.totalorder %s677_s28, %s673_s25 }
 0x27c   : > { %p675_p7 = pnand %p674_p4, %p778_p5 }
 0x27d   : > { %p680_p11 = por %p679_p10, %p678_p9 }
 0x27e   : > { %p676_p8 = pneg %p675_p7 }
 0x280   : > { %p681_p12 = pnand %p680_p11, %p676_p8 }
 0x282   : > { %684 = shalt.err (!%p681_p12)
}
 0x283   : > { %603 = dma.vmem_to_hbm [thread:$0]  (%p778_p5), %s477_s7, 128, %s833_s17, %s463_s13  }
 0x284 PF: > { %p609_p13 = scmp.ge.s32.totalorder %s719_s12, 2  ;;  %s488_s3 = sand.u32 1, %s707_s9  }
 0x285   : > { %s489_s4 = scalar_lea.sflag [#allocation3], %s488_s3 }
 0x286   : > { %p606_p0 = pnand %p609_p13, %p782_p6 }
 0x288   : > { %p607_p1 = pneg %p606_p0 }
 0x28a   : > { %702 = dma.done.wait (%p607_p1), %s489_s4, 128  }
 0x28b   : > { %704 = vsyncadd (%p607_p1), %s489_s4, 4294967168  ;;  %p12_p2 = scmp.ge.s32.totalorder %s765_s15, 5   ;;  %s877_s9 = smov %s711_s10 }
 0x28c   : > { %s878_s10 = smov %s715_s11  ;;  %s879_s11 = smov %s776_s18 }
 0x28d   : > { %s880_s12 = smov %s765_s15  ;;  %14 = sbr.rel (!%p12_p2) target bundleno = 3 (0x3), region = 66 }
 0x292   :  { %494 = vsyncpa [#allocation3], 1 }
 0x293   :  { %496 = vsyncpa [#allocation3 + $0x1], 1 }

</bundles_post_ra>
